<compile_context>
chip_gen: v5e
topology: v5e:2x2
jax: 0.10.0
libtpu: 0.0.40
codegen_flags: <defaults>
</compile_context>

<pallas_src>
import functools

import jax
import jax.numpy as jnp
from jax.experimental import pallas as pl
from jax.experimental.pallas import tpu as pltpu

_LANE = 128      # lane width (last dim)
_SUBLANE = 8     # f32 sublane width (second-to-last dim)


def _round_up(x, m):
    return ((x + m - 1) // m) * m


def _mlp_kernel(x_ref, w1_ref, b1_ref, w2_ref, b2_ref, o_ref):
    # Layer 1: (TB, F) @ (F, Hp) on the MXU, f32 accumulation.
    h = jnp.dot(x_ref[...], w1_ref[...], preferred_element_type=jnp.float32)
    h = jax.nn.sigmoid(h + b1_ref[...])          # f32 epilogue (EUP exp path)
    # Layer 2: (TB, Hp) @ (Hp, O), f32 accumulation; store at true width O.
    y = jnp.dot(h.astype(w2_ref.dtype), w2_ref[...],
                preferred_element_type=jnp.float32)
    o_ref[...] = (y + b2_ref[...]).astype(o_ref.dtype)


def prepare_params(w1, b1, w2, b2):
    """Pad the (tiny) hidden dim to 128 lanes ONCE, outside the jitted forward.

    w1: (F, H); b1: (1, H) or (H,); w2: (H, O); b2: (1, O) or (O,).
    Zero padding is exact: padded hidden units see b1=0 -> sigmoid(0)=0.5, which
    multiplies zero rows of W2, contributing nothing to the output.
    """
    F, H = w1.shape
    O = w2.shape[1]
    Hp = _round_up(H, _LANE)
    w1p = jnp.zeros((F, Hp), w1.dtype).at[:, :H].set(w1)
    b1p = jnp.zeros((1, Hp), b1.dtype).at[:, :H].set(jnp.reshape(b1, (1, H)))
    w2p = jnp.zeros((Hp, O), w2.dtype).at[:H, :].set(w2)
    b2p = jnp.reshape(b2, (1, O))
    return w1p, b1p, w2p, b2p


@functools.partial(jax.jit, static_argnames=("block_b",))
def mlp_forward(x, w1p, b1p, w2p, b2p, *, block_b=4096):
    """Fused 2-layer MLP forward.  x: (B, F); params from prepare_params()."""
    B, F = x.shape
    Hp = w1p.shape[1]
    O = w2p.shape[1]
    out_dtype = x.dtype
    itemsize = jnp.dtype(x.dtype).itemsize

    # Batch tile: multiple of 8 sublanes, large by default to amortize the
    # ~0.35 us per-grid-step overhead, capped at ceil(B/2) so there are >=2
    # tiles whenever B > 8 (lets the "parallel" axis shard across v7x's 2 TCs).
    TB = min(block_b, _round_up(B, _SUBLANE))
    if B > _SUBLANE:
        TB = min(TB, _round_up(pl.cdiv(B, 2), _SUBLANE))
    TB = _round_up(max(TB, _SUBLANE), _SUBLANE)
    n_tiles = pl.cdiv(B, TB)          # ragged last tile is masked by Pallas

    # VMEM footprint: double-buffered x/out tiles + resident weights/biases
    # + the f32 hidden intermediate.  Set a tight limit (not the full 64 MiB).
    vmem_bytes = (
        2 * (TB * F + TB * O) * itemsize
        + 2 * (F * Hp + Hp + Hp * O + O) * itemsize
        + TB * Hp * 4
    )
    vmem_limit = int(min(max(4 * vmem_bytes, 8 << 20), 32 << 20))

    # Advisory cost: unpadded HBM traffic, actual MXU work (padded H).
    cost = pl.CostEstimate(
        flops=2 * B * F * Hp + 2 * B * Hp * O,
        transcendentals=B * Hp,
        bytes_accessed=(B * F + F * Hp + Hp + Hp * O + O + B * O) * itemsize,
    )

    return pl.pallas_call(
        _mlp_kernel,
        out_shape=jax.ShapeDtypeStruct((B, O), out_dtype),
        grid_spec=pltpu.PrefetchScalarGridSpec(
            num_scalar_prefetch=0,
            grid=(n_tiles,),
            in_specs=[
                pl.BlockSpec((TB, F), lambda i: (i, 0)),   # X batch tile, true width F
                pl.BlockSpec((F, Hp), lambda i: (0, 0)),   # W1 (VMEM-resident)
                pl.BlockSpec((1, Hp), lambda i: (0, 0)),   # b1
                pl.BlockSpec((Hp, O), lambda i: (0, 0)),   # W2
                pl.BlockSpec((1, O), lambda i: (0, 0)),    # b2
            ],
            out_specs=pl.BlockSpec((TB, O), lambda i: (i, 0)),  # true width O
        ),
        compiler_params=pltpu.CompilerParams(
            dimension_semantics=("parallel",),   # megacore-shard batch tiles on v7x
            vmem_limit_bytes=vmem_limit,
        ),
        cost_estimate=cost,
    )(x, w1p, b1p, w2p, b2p)


def init_params(key, num_feats, num_out, num_hid, dtype=jnp.float32):
    """nn.Linear-style init; weights stored transposed as (in, out) for x @ W."""
    k1, k2, k3, k4 = jax.random.split(key, 4)
    bound1 = 1.0 / jnp.sqrt(num_feats)
    bound2 = 1.0 / jnp.sqrt(num_hid)
    w1 = jax.random.uniform(k1, (num_feats, num_hid), dtype, -bound1, bound1)
    b1 = jax.random.uniform(k2, (1, num_hid), dtype, -bound1, bound1)
    w2 = jax.random.uniform(k3, (num_hid, num_out), dtype, -bound2, bound2)
    b2 = jax.random.uniform(k4, (1, num_out), dtype, -bound2, bound2)
    return w1, b1, w2, b2


def _ref_forward(x, w1, b1, w2, b2):
    h = jax.nn.sigmoid(x @ w1 + b1)
    return h @ w2 + b2


if __name__ == "__main__":
    # Shapes consistent with the module: Network(num_feats=16, num_out=8, num_hid=32)
    num_feats, num_hid, num_out = 16, 32, 8
    key = jax.random.PRNGKey(0)
    kx, kp, kx2 = jax.random.split(key, 3)
    w1, b1, w2, b2 = init_params(kp, num_feats, num_out, num_hid)
    params = prepare_params(w1, b1, w2, b2)          # hoisted out of the hot path

    # Small-batch check (single tile, lane-masked output store).
    x = jax.random.normal(kx, (8, num_feats), dtype=jnp.float32)
    y = mlp_forward(x, *params)
    jax.block_until_ready(y)
    y_ref = _ref_forward(x, w1, b1, w2, b2)
    assert y.shape == (8, num_out)
    assert jnp.allclose(y, y_ref, atol=1e-5, rtol=1e-5)

    # Multi-tile check: 520 rows -> TB=264, 2 tiles, ragged (masked) last tile.
    x2 = jax.random.normal(kx2, (520, num_feats), dtype=jnp.float32)
    y2 = mlp_forward(x2, *params)
    jax.block_until_ready(y2)
    y2_ref = _ref_forward(x2, w1, b1, w2, b2)
    assert y2.shape == (520, num_out)
    assert jnp.allclose(y2, y2_ref, atol=1e-5, rtol=1e-5)

    # Optional bf16 streaming path (halves HBM traffic on v6e/v7x); f32 accumulation
    # and f32 epilogue inside the kernel, so accuracy stays close to the f32 reference.
    params_bf16 = prepare_params(w1.astype(jnp.bfloat16), b1.astype(jnp.bfloat16),
                                 w2.astype(jnp.bfloat16), b2.astype(jnp.bfloat16))
    yb = mlp_forward(x2.astype(jnp.bfloat16), *params_bf16)
    jax.block_until_ready(yb)
    assert yb.shape == (520, num_out)
    assert jnp.allclose(yb.astype(jnp.float32), y2_ref, atol=1e-1, rtol=1e-1)

    print("KERNEL_OK")
</pallas_src>

<mosaic_0001>
module attributes {stable_mosaic.version = 11 : i64} {
  func.func @_mlp_kernel(%arg0: i32, %arg1: memref<8x16xf32, #tpu.memory_space<vmem>>, %arg2: memref<16x128xf32, #tpu.memory_space<vmem>>, %arg3: memref<1x128xf32, #tpu.memory_space<vmem>>, %arg4: memref<128x8xf32, #tpu.memory_space<vmem>>, %arg5: memref<1x8xf32, #tpu.memory_space<vmem>>, %arg6: memref<8x8xf32, #tpu.memory_space<vmem>>) attributes {dimension_semantics = [#tpu.dimension_semantics<parallel>], iteration_bounds = array<i64: 1>, scalar_prefetch = 0 : i64, scratch_operands = 0 : i64, tpu.core_type = #tpu.core_type<tc>, window_params = [{transform_indices = @transform_0, window_bounds = array<i64: 8, 16>}, {pipeline_mode = #tpu.pipeline_mode<synchronous>, transform_indices = @transform_1, window_bounds = array<i64: 16, 128>}, {pipeline_mode = #tpu.pipeline_mode<synchronous>, transform_indices = @transform_2, window_bounds = array<i64: 1, 128>}, {pipeline_mode = #tpu.pipeline_mode<synchronous>, transform_indices = @transform_3, window_bounds = array<i64: 128, 8>}, {pipeline_mode = #tpu.pipeline_mode<synchronous>, transform_indices = @transform_4, window_bounds = array<i64: 1, 8>}, {transform_indices = @transform_5, window_bounds = array<i64: 8, 8>}]} {
    %c0 = arith.constant 0 : index
    %c0_0 = arith.constant 0 : index
    %0 = vector.load %arg1[%c0, %c0_0] : memref<8x16xf32, #tpu.memory_space<vmem>>, vector<8x16xf32>
    %c0_1 = arith.constant 0 : index
    %c0_2 = arith.constant 0 : index
    %1 = vector.load %arg2[%c0_1, %c0_2] : memref<16x128xf32, #tpu.memory_space<vmem>>, vector<16x128xf32>
    %cst = arith.constant dense<0.000000e+00> : vector<8x128xf32>
    %2 = tpu.matmul %0, %1, %cst {dimension_numbers = #tpu.dot_dimension_numbers<[1], [0], [0], [1], [0, 0, 1, 1], [], []>} : vector<8x16xf32>, vector<16x128xf32>, vector<8x128xf32> -> vector<8x128xf32>
    %c0_3 = arith.constant 0 : index
    %c0_4 = arith.constant 0 : index
    %3 = vector.load %arg3[%c0_3, %c0_4] : memref<1x128xf32, #tpu.memory_space<vmem>>, vector<1x128xf32>
    %4 = vector.broadcast %3 : vector<1x128xf32> to vector<8x128xf32>
    %5 = arith.addf %2, %4 : vector<8x128xf32>
    %6 = arith.negf %5 : vector<8x128xf32>
    %7 = math.exp %6 : vector<8x128xf32>
    %cst_5 = arith.constant 1.000000e+00 : f32
    %8 = vector.broadcast %cst_5 : f32 to vector<8x128xf32>
    %9 = arith.addf %8, %7 : vector<8x128xf32>
    %10 = arith.divf %8, %9 : vector<8x128xf32>
    %c0_6 = arith.constant 0 : index
    %c0_7 = arith.constant 0 : index
    %11 = vector.load %arg4[%c0_6, %c0_7] : memref<128x8xf32, #tpu.memory_space<vmem>>, vector<128x8xf32>
    %cst_8 = arith.constant dense<0.000000e+00> : vector<8x8xf32>
    %12 = tpu.matmul %10, %11, %cst_8 {dimension_numbers = #tpu.dot_dimension_numbers<[1], [0], [0], [1], [0, 0, 1, 1], [], []>} : vector<8x128xf32>, vector<128x8xf32>, vector<8x8xf32> -> vector<8x8xf32>
    %c0_9 = arith.constant 0 : index
    %c0_10 = arith.constant 0 : index
    %13 = vector.load %arg5[%c0_9, %c0_10] : memref<1x8xf32, #tpu.memory_space<vmem>>, vector<1x8xf32>
    %14 = vector.broadcast %13 : vector<1x8xf32> to vector<8x8xf32>
    %15 = arith.addf %12, %14 : vector<8x8xf32>
    %c0_11 = arith.constant 0 : index
    %c0_12 = arith.constant 0 : index
    %16 = vector.load %arg6[%c0_11, %c0_12] : memref<8x8xf32, #tpu.memory_space<vmem>>, vector<8x8xf32>
    tpu.vector_store %arg6[%c0_11, %c0_12], %15 {strides = array<i32>} : memref<8x8xf32, #tpu.memory_space<vmem>>, vector<8x8xf32>,
    return
  }
  func.func @transform_0(%arg0: i32) -> (i32, i32) {
    %c0_i32 = arith.constant 0 : i32
    %c0_i32_0 = arith.constant 0 : i32
    return %arg0, %c0_i32 : i32, i32
  }
  func.func @transform_1(%arg0: i32) -> (i32, i32) {
    %c0_i32 = arith.constant 0 : i32
    %c0_i32_0 = arith.constant 0 : i32
    %c0_i32_1 = arith.constant 0 : i32
    return %c0_i32, %c0_i32_0 : i32, i32
  }
  func.func @transform_2(%arg0: i32) -> (i32, i32) {
    %c0_i32 = arith.constant 0 : i32
    %c0_i32_0 = arith.constant 0 : i32
    %c0_i32_1 = arith.constant 0 : i32
    return %c0_i32, %c0_i32_0 : i32, i32
  }
  func.func @transform_3(%arg0: i32) -> (i32, i32) {
    %c0_i32 = arith.constant 0 : i32
    %c0_i32_0 = arith.constant 0 : i32
    %c0_i32_1 = arith.constant 0 : i32
    return %c0_i32, %c0_i32_0 : i32, i32
  }
  func.func @transform_4(%arg0: i32) -> (i32, i32) {
    %c0_i32 = arith.constant 0 : i32
    %c0_i32_0 = arith.constant 0 : i32
    %c0_i32_1 = arith.constant 0 : i32
    return %c0_i32, %c0_i32_0 : i32, i32
  }
  func.func @transform_5(%arg0: i32) -> (i32, i32) {
    %c0_i32 = arith.constant 0 : i32
    %c0_i32_0 = arith.constant 0 : i32
    return %arg0, %c0_i32 : i32, i32
  }
}

</mosaic_0001>

<bundles_post_ra>
// kernel: mlp_forward.1
= control target key start
LH: loop header
LB: loop body
LE: loop exit
PB: predicated region body
PF: predicated region fallthrough
CT: control target
= control target key end

     0   :  { %vm28_vm0 = vcmask 130048   ;;  %s261_s0 = inlined_call_operand.vmem [shape: f32[8,16], index: 0, kind: input, shape index: {}]   ;;  %s262_s1 = inlined_call_operand.vmem [shape: f32[16,128], index: 1, kind: input, shape index: {}]   ;;  %s263_s2 = inlined_call_operand.vmem [shape: f32[1,128], index: 2, kind: input, shape index: {}]   ;;  %s264_s3 = inlined_call_operand.vmem [shape: f32[128,8], index: 3, kind: input, shape index: {}]   ;;  %s265_s4 = inlined_call_operand.vmem [shape: f32[1,8], index: 4, kind: input, shape index: {}]   ;;  %s266_s5 = inlined_call_operand.hbm [shape: f32[8,8], index: 5, kind: output, shape index: {}]  }
   0x1   :  { %v23_v0 = vld [vmem:[%s262_s1 + $0x8] sm:$0xff]  ;;  %v22_v1 = vld [vmem:[%s262_s1] sm:$0xff] }
   0x2   :  { %46 = vmatpush.msra.mxu0 %v23_v0  ;;  %v21_v2 = vld [vmem:[%s261_s0] sm:$0xff] }
   0x3   :  { %10 = vsyncpa [#allocation3], 0  ;;  %v86_v3 = vld [vmem:[%s264_s3 + $0x78] sm:$0xff]  ;;  %v85_v4 = vld [vmem:[%s264_s3 + $0x70] sm:$0xff]  ;;  %s164_s29 = smov [#allocation2]   ;;  %s120_s8 = sshll.u32 %s266_s5, 4  ;;  %s121_s8 = int_to_ptr.hbm [resolvable:$true] %s120_s8 }
   0x4   :  { %47 = vmatpush.msra.mxu0 %v22_v1  ;;  %91 = vmatpush.msra.mxu1 %v86_v3  ;;  %v84_v5 = vld [vmem:[%s264_s3 + $0x68] sm:$0xff]  ;;  %v83_v6 = vld [vmem:[%s264_s3 + $0x60] sm:$0xff]  ;;  %v82_v7 = vld [vmem:[%s264_s3 + $0x58] sm:$0xff]  ;;  %s118_s30 = sshll.u32 %s164_s29, 4  ;;  %vm111_vm5 = vcmask 64512   ;;  %s119_s30 = int_to_ptr.vmem [resolvable:$true] %s118_s30 }
   0x5   :  { %129 = vmatmul.msk.f32.vlgmr.msra.gmra.mxu0 %vm28_vm0, %v21_v2  ;;  %v81_v8 = vld [vmem:[%s264_s3 + $0x50] sm:$0xff]  ;;  %v80_v9 = vld [vmem:[%s264_s3 + $0x48] sm:$0xff]  ;;  %v79_v10 = vld [vmem:[%s264_s3 + $0x40] sm:$0xff] }
   0x6   :  { %92 = vmatpush.msra.mxu1 %v85_v4  ;;  %v78_v11 = vld [vmem:[%s264_s3 + $0x38] sm:$0xff]  ;;  %v77_v12 = vld [vmem:[%s264_s3 + $0x30] sm:$0xff]  ;;  %v76_v13 = vld [vmem:[%s264_s3 + $0x28] sm:$0xff] }
   0x7   :  { %v75_v14 = vld [vmem:[%s264_s3 + $0x20] sm:$0xff]  ;;  %v74_v15 = vld [vmem:[%s264_s3 + $0x18] sm:$0xff]  ;;  %v73_v16 = vld [vmem:[%s264_s3 + $0x10] sm:$0xff] }
   0x8   :  { %93 = vmatpush.msra.mxu1 %v84_v5  ;;  %v72_v17 = vld [vmem:[%s264_s3 + $0x8] sm:$0xff]  ;;  %v71_v18 = vld [vmem:[%s264_s3] sm:$0xff] }
   0x9   :  { %v132_v19 = vld [vmem:[%s263_s2] ss:$0 sm:$0xff] }
   0xa   :  { %94 = vmatpush.msra.mxu1 %v83_v6  ;;  %v133_v35 = vld [vmem:[%s265_s4] ss:$0 sm:$0xff] }
   0xc   :  { %95 = vmatpush.msra.mxu1 %v82_v7 }
   0xe   :  { %96 = vmatpush.msra.mxu1 %v81_v8 }
  0x10   :  { %97 = vmatpush.msra.mxu1 %v80_v9 }
  0x12   :  { %98 = vmatpush.msra.mxu1 %v79_v10 }
  0x14   :  { %99 = vmatpush.msra.mxu1 %v78_v11 }
  0x16   :  { %100 = vmatpush.msra.mxu1 %v77_v12 }
  0x18   :  { %101 = vmatpush.msra.mxu1 %v76_v13 }
  0x1a   :  { %102 = vmatpush.msra.mxu1 %v75_v14 }
  0x1c   :  { %103 = vmatpush.msra.mxu1 %v74_v15 }
  0x1e   :  { %104 = vmatpush.msra.mxu1 %v73_v16 }
  0x20   :  { %105 = vmatpush.msra.mxu1 %v72_v17 }
  0x22   :  { %106 = vmatpush.msra.mxu1 %v71_v18 }
  0x82   :  { %v49_v20 = vpop.f32.mrf.mxu0 }
  0x83   :  { %v50_v21 = vadd.f32 %v132_v19, %v49_v20 }
  0x85   :  { %v130_v22 = vmul.f32 -1.442695, %v50_v21 }
  0x87   :  { %134 = vpow2.f32 %v130_v22 }
  0x8d   :  { %v135_v23 = vpop.eup %134 }
  0x8e   :  { %v55_v24 = vadd.f32 1.0, %v135_v23 }
  0x90   :  { %136 = vrcp.f32 %v55_v24  ;;  %v67_v28 = vand.u32 2147483648, %v55_v24  ;;  %v65_v30 = vand.u32 2147483647, %v55_v24  ;;  %vm61_vm2 = vweird.f32 %v55_v24 }
  0x92   :  { %v68_v32 = vor.u32 1.1754944e-38, %v67_v28  ;;  %vm66_vm4 = vcmp.eq.f32.partialorder %v65_v30, 8.507059e+37 }
  0x96   :  { %v137_v25 = vpop.eup %136 }
  0x97   :  { %v57_v26 = vmul.f32 %v137_v25, %v55_v24  ;;  %vm62_vm1 = vweird.f32 %v137_v25 }
  0x98   :  { %vm63_vm3 = vmor %vm61_vm2, %vm62_vm1 }
  0x99   :  { %v58_v27 = vsub.f32 1.0, %v57_v26 }
  0x9b   :  { %v59_v29 = vmul.f32 %v137_v25, %v58_v27 }
  0x9d   :  { %v60_v31 = vadd.f32 %v137_v25, %v59_v29 }
  0x9f   :  { %v64_v33 = vsel %vm63_vm3, %v137_v25, %v60_v31 }
  0xa0   :  { %v69_v34 = vsel %vm66_vm4, %v68_v32, %v64_v33 }
  0xa1   :  { %107 = vmatmul.f32.vlgmr.msra.gmra.mxu1 %v69_v34 }
 0x11e   :  { %v108_v36 = vpop.f32.mrf.mxu1 }
 0x11f   :  { %v109_v37 = vadd.f32 %v133_v35, %v108_v36 }
 0x121   :  { %112 = vst.msk [vmem:[#allocation2] sm:$0xff] %vm111_vm5, %v109_v37 }
 0x122   :  { %123 = dma.vmem_to_hbm [thread:$0]  %s119_s30, 128, %s121_s8, [#allocation3]  }
 0x123   :  { %162 = dma.done.wait [#allocation3], 128  }
 0x124   :  { %163 = vsyncadd [#allocation3], 4294967168 }
 0x125   :  { %128 = vsyncpa [#allocation3], 1 }

</bundles_post_ra>
